<compile_context>
chip_gen: v7x
topology: tpu7x:2x2x1
jax: 0.10.0
libtpu: 0.0.40
codegen_flags: <defaults>
</compile_context>

<pallas_src>
import functools
import math

import jax
import jax.numpy as jnp
from jax import lax
from jax.experimental import pallas as pl
from jax.experimental.pallas import tpu as pltpu

_LOG2E = 1.4426950408889634


# ---------------------------------------------------------------------------
# Kernel
# ---------------------------------------------------------------------------
def _flash_kernel(q_ref, k_ref, v_ref, o_ref, qs_ref, m_ref, l_ref, acc_ref,
                  *, scale, compute_dtype, n_heads_g, dv, tk, nk_valid, mask_kv):
    """One (head-group, q-tile, kv-tile) step of online-softmax attention.

    q_ref: (g, tq, Dk)   k_ref: (g, tk, Dk)   v_ref: (g, tk, Dv)
    o_ref: (1, tq, g*Dv) lane-dense output block.
    qs_ref: (g, tq, Dk) staged, pre-scaled q in the MXU compute dtype.
    m_ref / l_ref: (g, tq, 1) f32, acc_ref: (g, tq, Dv) f32.
    Softmax statistics are kept in base-2 units (scale includes log2(e)).
    """
    ki = pl.program_id(2)

    @pl.when(ki == 0)
    def _init():
        # Stage the scaled q tile once per (group, q-tile); reused across the
        # whole kv loop.  The scale fold (1/sqrt(d) * log2(e)) stays in f32.
        qs_ref[...] = (q_ref[...].astype(jnp.float32) * scale).astype(compute_dtype)
        m_ref[...] = jnp.full(m_ref.shape, -jnp.inf, dtype=m_ref.dtype)
        l_ref[...] = jnp.zeros(l_ref.shape, dtype=l_ref.dtype)
        acc_ref[...] = jnp.zeros(acc_ref.shape, dtype=acc_ref.dtype)

    q = qs_ref[...]
    k = k_ref[...]
    v = v_ref[...]
    if k.dtype != compute_dtype:
        k = k.astype(compute_dtype)
    if v.dtype != compute_dtype:
        v = v.astype(compute_dtype)

    # s[g, q, k] = scale * sum_d q[g, q, d] * k[g, k, d]   (base-2 logits)
    # Contract the last dims of both operands -> no k transpose materialized;
    # MXU accumulates in f32 regardless of operand dtype.
    s = lax.dot_general(
        q, k,
        dimension_numbers=(((2,), (2,)), ((0,), (0,))),
        preferred_element_type=jnp.float32,
    )

    if mask_kv:
        # Mask out zero-padded kv columns (only generated when Nk was padded).
        col = ki * tk + lax.broadcasted_iota(jnp.int32, (1, 1, tk), 2)
        s = jnp.where(col < nk_valid, s, -1e30)

    # Online (flash) softmax update, base-2.
    m_prev = m_ref[...]
    m_new = jnp.maximum(m_prev, jnp.max(s, axis=-1, keepdims=True))
    alpha = jnp.exp2(m_prev - m_new)
    p = jnp.exp2(s - m_new)

    l_ref[...] = alpha * l_ref[...] + jnp.sum(p, axis=-1, keepdims=True)

    # pv[g, q, d] = sum_k p[g, q, k] * v[g, k, d]; p fed to the MXU in the
    # compute dtype (bf16 when inputs are bf16 or bf16_mxu is requested).
    pv = lax.dot_general(
        p.astype(compute_dtype), v,
        dimension_numbers=(((2,), (1,)), ((0,), (0,))),
        preferred_element_type=jnp.float32,
    )
    acc_ref[...] = alpha * acc_ref[...] + pv
    m_ref[...] = m_new

    @pl.when(ki == pl.num_programs(2) - 1)
    def _finalize():
        l = l_ref[...]
        r = pl.reciprocal(l, approx=True)      # EUP vrcp — off the VALU path
        r = r * (2.0 - l * r)                  # one Newton step -> ~full precision
        o = (acc_ref[...] * r).astype(o_ref.dtype)   # (g, tq, Dv)
        # Lane-dense writeback: heads of the group concatenated along lanes.
        for j in range(n_heads_g):
            o_ref[0, :, j * dv:(j + 1) * dv] = o[j]


# ---------------------------------------------------------------------------
# Trace-time VMEM / tiling heuristics
# ---------------------------------------------------------------------------
def _round_up(x, m):
    return ((x + m - 1) // m) * m


def _cdiv(a, b):
    return -(-a // b)


def _vmem_caps():
    """(vmem_limit_bytes, per-grid-step working-set budget) for this chip."""
    cap = 64 * 1024 * 1024            # conservative default (v7x per-TC VMEM)
    try:
        info = pltpu.get_tpu_info()
        cap = int(getattr(info, "vmem_capacity_bytes", cap))
    except Exception:
        pass
    vmem_limit = max(32 * 1024 * 1024, (cap * 3) // 4)   # leave compiler headroom
    budget = max(8 * 1024 * 1024, cap // 4)              # pipeline + scratch + temps
    return vmem_limit, budget


def _balanced_tile(n, cap, mult):
    """Tile size <= cap (multiple of mult) minimizing padding of n."""
    n_r = _round_up(n, mult)
    if n_r <= cap:
        return n_r
    ntiles = _cdiv(n_r, cap)
    return _round_up(_cdiv(n_r, ntiles), mult)


def _choose_tiling(BH, h, Nq, Nk, Dk, Dv, in_isz, comp_isz, budget):
    """Pick (head-group g, q tile tq, kv tile tk) for the given VMEM budget."""
    min_isz = min(in_isz, comp_isz)
    sub = {4: 8, 2: 16, 1: 32}.get(min_isz, 8)   # sublane multiple per dtype

    def per_step_bytes(g, tq, tk):
        return (2 * g * tq * Dk * in_isz            # q blocks (double-buffered)
                + 2 * g * tk * (Dk + Dv) * in_isz   # k + v blocks
                + 2 * tq * g * Dv * in_isz          # lane-dense out block
                + g * tq * Dk * comp_isz            # staged scaled-q scratch
                + g * tq * (Dv + 2) * 4             # f32 acc + m + l scratch
                + 3 * g * tq * tk * 4)              # s / p / cast temporaries

    # Head-group candidates: divisors of n_heads (<= 8) so the group never
    # splits a head across grid blocks and the wrapper un-pack stays a single
    # transpose.
    g_cands = [d for d in range(min(h, 8), 0, -1) if h % d == 0]

    tq_cap, tk_cap = 512, 1024     # grow tq before tk: K/V re-streamed Nq/tq times
    g, tq, tk = 1, sub, sub
    while True:
        tq = _balanced_tile(Nq, tq_cap, sub)
        tk = _balanced_tile(Nk, tk_cap, sub)
        g_ok = next((d for d in g_cands if per_step_bytes(d, tq, tk) <= budget), None)
        if g_ok is not None:
            g = g_ok
            break
        if tk_cap > sub:
            tk_cap = max(sub, tk_cap // 2)
        elif tq_cap > sub:
            tq_cap = max(sub, tq_cap // 2)
        else:
            g = 1
            break

    # Megacore (v7x has 2 TensorCores): keep >= 2 blocks along the two
    # "parallel" grid axes so one core never idles; trade head-grouping for it.
    while g > 1 and (BH // g) * _cdiv(Nq, tq) < 2:
        g = next(d for d in g_cands if d < g)

    return g, tq, tk


# ---------------------------------------------------------------------------
# pallas_call wrapper on head-split tensors
# ---------------------------------------------------------------------------
def _sdpa_pallas(qh, kh, vh, n_heads, bf16_mxu=False):
    """qh: (BH, Nq, Dk), kh: (BH, Nk, Dk), vh: (BH, Nk, Dv).

    Returns ((BH//g, Nq, g*Dv) lane-dense output, g)."""
    BH, Nq, Dk = qh.shape
    _, Nk, Dv = vh.shape

    compute_dtype = qh.dtype
    if bf16_mxu and qh.dtype == jnp.float32:
        compute_dtype = jnp.bfloat16

    in_isz = jnp.dtype(qh.dtype).itemsize
    comp_isz = jnp.dtype(compute_dtype).itemsize
    vmem_limit, budget = _vmem_caps()
    g, tq, tk = _choose_tiling(BH, n_heads, Nq, Nk, Dk, Dv, in_isz, comp_isz, budget)

    # Pad ragged sequence lengths up to the tile size; padded K/V columns are
    # masked inside the kernel, padded q rows are sliced off afterwards.
    Nq_pad = _round_up(Nq, tq)
    Nk_pad = _round_up(Nk, tk)
    if Nq_pad != Nq:
        qh = jnp.pad(qh, ((0, 0), (0, Nq_pad - Nq), (0, 0)))
    if Nk_pad != Nk:
        kh = jnp.pad(kh, ((0, 0), (0, Nk_pad - Nk), (0, 0)))
        vh = jnp.pad(vh, ((0, 0), (0, Nk_pad - Nk), (0, 0)))

    scale = float((1.0 / math.sqrt(Dk)) * _LOG2E)   # base-2 logits
    grid = (BH // g, Nq_pad // tq, Nk_pad // tk)

    kernel = functools.partial(
        _flash_kernel, scale=scale, compute_dtype=compute_dtype,
        n_heads_g=g, dv=Dv, tk=tk, nk_valid=Nk, mask_kv=(Nk_pad != Nk))

    # TODO(synk): on v5e, if profiling shows exposed k/v DMA, switch the k/v
    # BlockSpecs to pipeline_mode=pl.Buffered(3).
    out = pl.pallas_call(
        kernel,
        out_shape=jax.ShapeDtypeStruct((BH // g, Nq_pad, g * Dv), qh.dtype),
        grid_spec=pltpu.PrefetchScalarGridSpec(
            num_scalar_prefetch=0,
            grid=grid,
            in_specs=[
                pl.BlockSpec((g, tq, Dk), lambda b, qi, ki: (b, qi, 0)),
                pl.BlockSpec((g, tk, Dk), lambda b, qi, ki: (b, ki, 0)),
                pl.BlockSpec((g, tk, Dv), lambda b, qi, ki: (b, ki, 0)),
            ],
            out_specs=pl.BlockSpec((1, tq, g * Dv), lambda b, qi, ki: (b, qi, 0)),
            scratch_shapes=[
                pltpu.VMEM((g, tq, Dk), compute_dtype),   # staged, scaled q
                pltpu.VMEM((g, tq, 1), jnp.float32),      # running max (base-2)
                pltpu.VMEM((g, tq, 1), jnp.float32),      # running denominator
                pltpu.VMEM((g, tq, Dv), jnp.float32),     # f32 output accumulator
            ],
        ),
        compiler_params=pltpu.CompilerParams(
            dimension_semantics=("parallel", "parallel", "arbitrary"),
            vmem_limit_bytes=vmem_limit,
        ),
    )(qh, kh, vh)

    return out[:, :Nq, :], g


# ---------------------------------------------------------------------------
# Module-level wrapper (matches MHAttention.forward semantics)
# ---------------------------------------------------------------------------
def mh_attention(q, k, v, n_heads=4, bf16_mxu=False):
    """Forward pass of MHAttention (is_causal=False, dropout=0, attn_mask=None).

    q, k, v: (bs, n, d*h) with the last dim laid out as '(d h)' (d outer,
    h inner), matching the einops pattern in the PyTorch module.
    """
    assert q.shape[-1] == k.shape[-1]
    assert k.shape[-2] == v.shape[-2]
    h = n_heads
    assert q.shape[-1] % h == 0 and v.shape[-1] % h == 0

    def split_heads(x):
        bs_, n_, dh_ = x.shape
        d_ = dh_ // h
        x = x.reshape(bs_, n_, d_, h)            # 'bs n (d h) -> bs n d h'
        x = jnp.transpose(x, (0, 3, 1, 2))       # -> (bs, h, n, d)
        return x.reshape(bs_ * h, n_, d_)

    qh, kh, vh = split_heads(q), split_heads(k), split_heads(v)

    ko, g = _sdpa_pallas(qh, kh, vh, h, bf16_mxu=bf16_mxu)  # (bs*h//g, nq, g*dv)

    bs, nq = q.shape[0], q.shape[1]
    dv = v.shape[-1] // h
    # Un-pack the lane-dense kernel output back to the '(d h)' module layout
    # (g divides h by construction, so one fused permutation suffices).
    out = ko.reshape(bs, h // g, nq, g, dv)        # [b, j1, n, j0, i]
    out = jnp.transpose(out, (0, 2, 4, 1, 3))      # -> [b, n, i, j1, j0]
    return out.reshape(bs, nq, dv * h)             # 'bs h n d -> bs n (d h)'


# ---------------------------------------------------------------------------
# Pure-JAX reference
# ---------------------------------------------------------------------------
def _reference(q, k, v, n_heads=4):
    h = n_heads
    bs, n, dh = q.shape
    d = dh // h

    def split(x):
        b, nn, _ = x.shape
        return jnp.transpose(x.reshape(b, nn, x.shape[-1] // h, h), (0, 3, 1, 2))

    qh, kh, vh = split(q), split(k), split(v)
    s = jnp.einsum("bhqd,bhkd->bhqk", qh, kh) / math.sqrt(d)
    p = jax.nn.softmax(s, axis=-1)
    o = jnp.einsum("bhqk,bhkd->bhqd", p, vh)
    return jnp.transpose(o, (0, 2, 3, 1)).reshape(bs, n, -1)


if __name__ == "__main__":
    # Small shapes implied by the module: hidden = n_heads * d_head = 32.
    bs, n, n_heads, d_head = 2, 8, 4, 8
    hidden = n_heads * d_head

    key = jax.random.PRNGKey(0)
    kq, kk, kv = jax.random.split(key, 3)
    q = jax.random.normal(kq, (bs, n, hidden), dtype=jnp.float32)
    k = jax.random.normal(kk, (bs, n, hidden), dtype=jnp.float32)
    v = jax.random.normal(kv, (bs, n, hidden), dtype=jnp.float32)

    out = jax.block_until_ready(mh_attention(q, k, v, n_heads=n_heads))
    ref = _reference(q, k, v, n_heads=n_heads)
    assert out.shape == (bs, n, hidden)
    assert jnp.allclose(out, ref, atol=1e-3, rtol=1e-3), "f32 small-shape mismatch"

    # bf16 inputs (bf16 tiles + sublane-16 tiling + padded/masked kv columns).
    qb, kb, vb = (x.astype(jnp.bfloat16) for x in (q, k, v))
    out_b = jax.block_until_ready(mh_attention(qb, kb, vb, n_heads=n_heads))
    ref_b = _reference(qb.astype(jnp.float32), kb.astype(jnp.float32),
                       vb.astype(jnp.float32), n_heads=n_heads)
    assert jnp.allclose(out_b.astype(jnp.float32), ref_b, atol=1e-1, rtol=1e-1), \
        "bf16 path mismatch"

    # Moderate ragged shape exercising the tiled flash path: multiple q tiles,
    # multiple kv steps, head grouping, and padded-column masking.
    bs2, n2, d2 = 1, 1100, 64
    hidden2 = n_heads * d2
    k2q, k2k, k2v = jax.random.split(jax.random.PRNGKey(1), 3)
    q2 = jax.random.normal(k2q, (bs2, n2, hidden2), dtype=jnp.float32)
    k2 = jax.random.normal(k2k, (bs2, n2, hidden2), dtype=jnp.float32)
    v2 = jax.random.normal(k2v, (bs2, n2, hidden2), dtype=jnp.float32)
    out2 = jax.block_until_ready(mh_attention(q2, k2, v2, n_heads=n_heads))
    ref2 = _reference(q2, k2, v2, n_heads=n_heads)
    assert jnp.allclose(out2, ref2, atol=2e-3, rtol=2e-3), "tiled/masked-path mismatch"

    # Optional bf16-MXU path for f32 inputs (flash-attention-standard accuracy).
    out3 = jax.block_until_ready(
        mh_attention(q2, k2, v2, n_heads=n_heads, bf16_mxu=True))
    assert jnp.allclose(out3, ref2, atol=3e-2, rtol=3e-2), "bf16-MXU path mismatch"

    print("KERNEL_OK")
</pallas_src>

<mosaic_0001>
module attributes {stable_mosaic.version = 11 : i64} {
  func.func @_flash_kernel(%arg0: i32, %arg1: i32, %arg2: i32, %arg3: memref<4x8x8xf32, #tpu.memory_space<vmem>>, %arg4: memref<4x8x8xf32, #tpu.memory_space<vmem>>, %arg5: memref<4x8x8xf32, #tpu.memory_space<vmem>>, %arg6: memref<1x8x32xf32, #tpu.memory_space<vmem>>, %arg7: memref<4x8x8xf32, #tpu.memory_space<vmem>>, %arg8: memref<4x8x1xf32, #tpu.memory_space<vmem>>, %arg9: memref<4x8x1xf32, #tpu.memory_space<vmem>>, %arg10: memref<4x8x8xf32, #tpu.memory_space<vmem>>) attributes {dimension_semantics = [#tpu.dimension_semantics<parallel>, #tpu.dimension_semantics<parallel>, #tpu.dimension_semantics<arbitrary>], iteration_bounds = array<i64: 2, 1, 1>, scalar_prefetch = 0 : i64, scratch_operands = 4 : i64, tpu.core_type = #tpu.core_type<tc>, window_params = [{transform_indices = @transform_0, window_bounds = array<i64: 4, 8, 8>}, {transform_indices = @transform_1, window_bounds = array<i64: 4, 8, 8>}, {transform_indices = @transform_2, window_bounds = array<i64: 4, 8, 8>}, {transform_indices = @transform_3, window_bounds = array<i64: 1, 8, 32>}]} {
    %c0_i32 = arith.constant 0 : i32
    %0 = arith.cmpi eq, %arg2, %c0_i32 : i32
    %1 = arith.extui %0 : i1 to i32
    %c0_i32_0 = arith.constant 0 : i32
    %2 = arith.cmpi ne, %1, %c0_i32_0 : i32
    scf.if %2 {
      %c0_32 = arith.constant 0 : index
      %c0_33 = arith.constant 0 : index
      %c0_34 = arith.constant 0 : index
      %32 = vector.load %arg3[%c0_32, %c0_33, %c0_34] : memref<4x8x8xf32, #tpu.memory_space<vmem>>, vector<4x8x8xf32>
      %cst_35 = arith.constant 0.510069728 : f32
      %33 = vector.broadcast %cst_35 : f32 to vector<4x8x8xf32>
      %34 = arith.mulf %32, %33 : vector<4x8x8xf32>
      %c0_36 = arith.constant 0 : index
      %c0_37 = arith.constant 0 : index
      %c0_38 = arith.constant 0 : index
      %35 = vector.load %arg7[%c0_36, %c0_37, %c0_38] : memref<4x8x8xf32, #tpu.memory_space<vmem>>, vector<4x8x8xf32>
      tpu.vector_store %arg7[%c0_36, %c0_37, %c0_38], %34 {strides = array<i32>} : memref<4x8x8xf32, #tpu.memory_space<vmem>>, vector<4x8x8xf32>,
      %cst_39 = arith.constant 0xFF800000 : f32
      %36 = vector.broadcast %cst_39 : f32 to vector<4x8x1xf32>
      %c0_40 = arith.constant 0 : index
      %c0_41 = arith.constant 0 : index
      %c0_42 = arith.constant 0 : index
      %37 = vector.load %arg8[%c0_40, %c0_41, %c0_42] : memref<4x8x1xf32, #tpu.memory_space<vmem>>, vector<4x8x1xf32>
      tpu.vector_store %arg8[%c0_40, %c0_41, %c0_42], %36 {strides = array<i32>} : memref<4x8x1xf32, #tpu.memory_space<vmem>>, vector<4x8x1xf32>,
      %cst_43 = arith.constant 0.000000e+00 : f32
      %38 = vector.broadcast %cst_43 : f32 to vector<4x8x1xf32>
      %c0_44 = arith.constant 0 : index
      %c0_45 = arith.constant 0 : index
      %c0_46 = arith.constant 0 : index
      %39 = vector.load %arg9[%c0_44, %c0_45, %c0_46] : memref<4x8x1xf32, #tpu.memory_space<vmem>>, vector<4x8x1xf32>
      tpu.vector_store %arg9[%c0_44, %c0_45, %c0_46], %38 {strides = array<i32>} : memref<4x8x1xf32, #tpu.memory_space<vmem>>, vector<4x8x1xf32>,
      %cst_47 = arith.constant 0.000000e+00 : f32
      %40 = vector.broadcast %cst_47 : f32 to vector<4x8x8xf32>
      %c0_48 = arith.constant 0 : index
      %c0_49 = arith.constant 0 : index
      %c0_50 = arith.constant 0 : index
      %41 = vector.load %arg10[%c0_48, %c0_49, %c0_50] : memref<4x8x8xf32, #tpu.memory_space<vmem>>, vector<4x8x8xf32>
      tpu.vector_store %arg10[%c0_48, %c0_49, %c0_50], %40 {strides = array<i32>} : memref<4x8x8xf32, #tpu.memory_space<vmem>>, vector<4x8x8xf32>,
    } else {
    }
    %c0 = arith.constant 0 : index
    %c0_1 = arith.constant 0 : index
    %c0_2 = arith.constant 0 : index
    %3 = vector.load %arg7[%c0, %c0_1, %c0_2] : memref<4x8x8xf32, #tpu.memory_space<vmem>>, vector<4x8x8xf32>
    %c0_3 = arith.constant 0 : index
    %c0_4 = arith.constant 0 : index
    %c0_5 = arith.constant 0 : index
    %4 = vector.load %arg4[%c0_3, %c0_4, %c0_5] : memref<4x8x8xf32, #tpu.memory_space<vmem>>, vector<4x8x8xf32>
    %c0_6 = arith.constant 0 : index
    %c0_7 = arith.constant 0 : index
    %c0_8 = arith.constant 0 : index
    %5 = vector.load %arg5[%c0_6, %c0_7, %c0_8] : memref<4x8x8xf32, #tpu.memory_space<vmem>>, vector<4x8x8xf32>
    %cst = arith.constant dense<0.000000e+00> : vector<4x8x8xf32>
    %6 = tpu.matmul %3, %4, %cst {dimension_numbers = #tpu.dot_dimension_numbers<[2], [2], [1], [1], [0, 0, 0, 1, 1, 1], [0], [0]>} : vector<4x8x8xf32>, vector<4x8x8xf32>, vector<4x8x8xf32> -> vector<4x8x8xf32>
    %c0_9 = arith.constant 0 : index
    %c0_10 = arith.constant 0 : index
    %c0_11 = arith.constant 0 : index
    %7 = vector.load %arg8[%c0_9, %c0_10, %c0_11] : memref<4x8x1xf32, #tpu.memory_space<vmem>>, vector<4x8x1xf32>
    %cst_12 = arith.constant dense<0xFF800000> : vector<4x8xf32>
    %8 = vector.multi_reduction <maximumf>, %6, %cst_12 [2] : vector<4x8x8xf32> to vector<4x8xf32>
    %9 = vector.shape_cast %8 : vector<4x8xf32> to vector<4x8x1xf32>
    %10 = arith.maximumf %7, %9 : vector<4x8x1xf32>
    %11 = arith.subf %7, %10 : vector<4x8x1xf32>
    %12 = math.exp2 %11 : vector<4x8x1xf32>
    %13 = vector.broadcast %10 : vector<4x8x1xf32> to vector<4x8x8xf32>
    %14 = arith.subf %6, %13 : vector<4x8x8xf32>
    %15 = math.exp2 %14 : vector<4x8x8xf32>
    %c0_13 = arith.constant 0 : index
    %c0_14 = arith.constant 0 : index
    %c0_15 = arith.constant 0 : index
    %16 = vector.load %arg9[%c0_13, %c0_14, %c0_15] : memref<4x8x1xf32, #tpu.memory_space<vmem>>, vector<4x8x1xf32>
    %17 = arith.mulf %12, %16 : vector<4x8x1xf32>
    %cst_16 = arith.constant dense<0.000000e+00> : vector<4x8xf32>
    %18 = vector.multi_reduction <add>, %15, %cst_16 [2] : vector<4x8x8xf32> to vector<4x8xf32>
    %19 = vector.shape_cast %18 : vector<4x8xf32> to vector<4x8x1xf32>
    %20 = arith.addf %17, %19 : vector<4x8x1xf32>
    %c0_17 = arith.constant 0 : index
    %c0_18 = arith.constant 0 : index
    %c0_19 = arith.constant 0 : index
    %21 = vector.load %arg9[%c0_17, %c0_18, %c0_19] : memref<4x8x1xf32, #tpu.memory_space<vmem>>, vector<4x8x1xf32>
    tpu.vector_store %arg9[%c0_17, %c0_18, %c0_19], %20 {strides = array<i32>} : memref<4x8x1xf32, #tpu.memory_space<vmem>>, vector<4x8x1xf32>,
    %cst_20 = arith.constant dense<0.000000e+00> : vector<4x8x8xf32>
    %22 = tpu.matmul %15, %5, %cst_20 {dimension_numbers = #tpu.dot_dimension_numbers<[2], [1], [1], [2], [0, 0, 0, 1, 1, 2], [0], [0]>} : vector<4x8x8xf32>, vector<4x8x8xf32>, vector<4x8x8xf32> -> vector<4x8x8xf32>
    %c0_21 = arith.constant 0 : index
    %c0_22 = arith.constant 0 : index
    %c0_23 = arith.constant 0 : index
    %23 = vector.load %arg10[%c0_21, %c0_22, %c0_23] : memref<4x8x8xf32, #tpu.memory_space<vmem>>, vector<4x8x8xf32>
    %24 = vector.broadcast %12 : vector<4x8x1xf32> to vector<4x8x8xf32>
    %25 = arith.mulf %24, %23 : vector<4x8x8xf32>
    %26 = arith.addf %25, %22 : vector<4x8x8xf32>
    %c0_24 = arith.constant 0 : index
    %c0_25 = arith.constant 0 : index
    %c0_26 = arith.constant 0 : index
    %27 = vector.load %arg10[%c0_24, %c0_25, %c0_26] : memref<4x8x8xf32, #tpu.memory_space<vmem>>, vector<4x8x8xf32>
    tpu.vector_store %arg10[%c0_24, %c0_25, %c0_26], %26 {strides = array<i32>} : memref<4x8x8xf32, #tpu.memory_space<vmem>>, vector<4x8x8xf32>,
    %c0_27 = arith.constant 0 : index
    %c0_28 = arith.constant 0 : index
    %c0_29 = arith.constant 0 : index
    %28 = vector.load %arg8[%c0_27, %c0_28, %c0_29] : memref<4x8x1xf32, #tpu.memory_space<vmem>>, vector<4x8x1xf32>
    tpu.vector_store %arg8[%c0_27, %c0_28, %c0_29], %10 {strides = array<i32>} : memref<4x8x1xf32, #tpu.memory_space<vmem>>, vector<4x8x1xf32>,
    %c0_i32_30 = arith.constant 0 : i32
    %29 = arith.cmpi eq, %arg2, %c0_i32_30 : i32
    %30 = arith.extui %29 : i1 to i32
    %c0_i32_31 = arith.constant 0 : i32
    %31 = arith.cmpi ne, %30, %c0_i32_31 : i32
    scf.if %31 {
      %c0_32 = arith.constant 0 : index
      %c0_33 = arith.constant 0 : index
      %c0_34 = arith.constant 0 : index
      %32 = vector.load %arg9[%c0_32, %c0_33, %c0_34] : memref<4x8x1xf32, #tpu.memory_space<vmem>>, vector<4x8x1xf32>
      %33 = tpu.reciprocal %32 {approx = true} : vector<4x8x1xf32> -> vector<4x8x1xf32>
      %34 = arith.mulf %32, %33 : vector<4x8x1xf32>
      %cst_35 = arith.constant 2.000000e+00 : f32
      %35 = vector.broadcast %cst_35 : f32 to vector<4x8x1xf32>
      %36 = arith.subf %35, %34 : vector<4x8x1xf32>
      %37 = arith.mulf %33, %36 : vector<4x8x1xf32>
      %c0_36 = arith.constant 0 : index
      %c0_37 = arith.constant 0 : index
      %c0_38 = arith.constant 0 : index
      %38 = vector.load %arg10[%c0_36, %c0_37, %c0_38] : memref<4x8x8xf32, #tpu.memory_space<vmem>>, vector<4x8x8xf32>
      %39 = vector.broadcast %37 : vector<4x8x1xf32> to vector<4x8x8xf32>
      %40 = arith.mulf %38, %39 : vector<4x8x8xf32>
      %41 = vector.extract_strided_slice %40 {offsets = [0, 0, 0], sizes = [1, 8, 8], strides = [1, 1, 1]} : vector<4x8x8xf32> to vector<1x8x8xf32>
      %42 = vector.shape_cast %41 : vector<1x8x8xf32> to vector<8x8xf32>
      %c0_39 = arith.constant 0 : index
      %c0_40 = arith.constant 0 : index
      %c0_41 = arith.constant 0 : index
      %43 = vector.load %arg6[%c0_39, %c0_40, %c0_41] : memref<1x8x32xf32, #tpu.memory_space<vmem>>, vector<1x8x8xf32>
      %44 = vector.shape_cast %43 : vector<1x8x8xf32> to vector<8x8xf32>
      %45 = vector.shape_cast %42 : vector<8x8xf32> to vector<1x8x8xf32>
      tpu.vector_store %arg6[%c0_39, %c0_40, %c0_41], %45 {strides = array<i32>} : memref<1x8x32xf32, #tpu.memory_space<vmem>>, vector<1x8x8xf32>,
      %46 = vector.extract_strided_slice %40 {offsets = [1, 0, 0], sizes = [1, 8, 8], strides = [1, 1, 1]} : vector<4x8x8xf32> to vector<1x8x8xf32>
      %47 = vector.shape_cast %46 : vector<1x8x8xf32> to vector<8x8xf32>
      %c0_42 = arith.constant 0 : index
      %c0_43 = arith.constant 0 : index
      %c8 = arith.constant 8 : index
      %48 = vector.load %arg6[%c0_42, %c0_43, %c8] : memref<1x8x32xf32, #tpu.memory_space<vmem>>, vector<1x8x8xf32>
      %49 = vector.shape_cast %48 : vector<1x8x8xf32> to vector<8x8xf32>
      %50 = vector.shape_cast %47 : vector<8x8xf32> to vector<1x8x8xf32>
      tpu.vector_store %arg6[%c0_42, %c0_43, %c8], %50 {strides = array<i32>} : memref<1x8x32xf32, #tpu.memory_space<vmem>>, vector<1x8x8xf32>,
      %51 = vector.extract_strided_slice %40 {offsets = [2, 0, 0], sizes = [1, 8, 8], strides = [1, 1, 1]} : vector<4x8x8xf32> to vector<1x8x8xf32>
      %52 = vector.shape_cast %51 : vector<1x8x8xf32> to vector<8x8xf32>
      %c0_44 = arith.constant 0 : index
      %c0_45 = arith.constant 0 : index
      %c16 = arith.constant 16 : index
      %53 = vector.load %arg6[%c0_44, %c0_45, %c16] : memref<1x8x32xf32, #tpu.memory_space<vmem>>, vector<1x8x8xf32>
      %54 = vector.shape_cast %53 : vector<1x8x8xf32> to vector<8x8xf32>
      %55 = vector.shape_cast %52 : vector<8x8xf32> to vector<1x8x8xf32>
      tpu.vector_store %arg6[%c0_44, %c0_45, %c16], %55 {strides = array<i32>} : memref<1x8x32xf32, #tpu.memory_space<vmem>>, vector<1x8x8xf32>,
      %56 = vector.extract_strided_slice %40 {offsets = [3, 0, 0], sizes = [1, 8, 8], strides = [1, 1, 1]} : vector<4x8x8xf32> to vector<1x8x8xf32>
      %57 = vector.shape_cast %56 : vector<1x8x8xf32> to vector<8x8xf32>
      %c0_46 = arith.constant 0 : index
      %c0_47 = arith.constant 0 : index
      %c24 = arith.constant 24 : index
      %58 = vector.load %arg6[%c0_46, %c0_47, %c24] : memref<1x8x32xf32, #tpu.memory_space<vmem>>, vector<1x8x8xf32>
      %59 = vector.shape_cast %58 : vector<1x8x8xf32> to vector<8x8xf32>
      %60 = vector.shape_cast %57 : vector<8x8xf32> to vector<1x8x8xf32>
      tpu.vector_store %arg6[%c0_46, %c0_47, %c24], %60 {strides = array<i32>} : memref<1x8x32xf32, #tpu.memory_space<vmem>>, vector<1x8x8xf32>,
    } else {
    }
    return
  }
  func.func @transform_0(%arg0: i32, %arg1: i32, %arg2: i32) -> (i32, i32, i32) {
    %c0_i32 = arith.constant 0 : i32
    %c0_i32_0 = arith.constant 0 : i32
    return %arg0, %arg1, %c0_i32 : i32, i32, i32
  }
  func.func @transform_1(%arg0: i32, %arg1: i32, %arg2: i32) -> (i32, i32, i32) {
    %c0_i32 = arith.constant 0 : i32
    %c0_i32_0 = arith.constant 0 : i32
    return %arg0, %arg2, %c0_i32 : i32, i32, i32
  }
  func.func @transform_2(%arg0: i32, %arg1: i32, %arg2: i32) -> (i32, i32, i32) {
    %c0_i32 = arith.constant 0 : i32
    %c0_i32_0 = arith.constant 0 : i32
    return %arg0, %arg2, %c0_i32 : i32, i32, i32
  }
  func.func @transform_3(%arg0: i32, %arg1: i32, %arg2: i32) -> (i32, i32, i32) {
    %c0_i32 = arith.constant 0 : i32
    %c0_i32_0 = arith.constant 0 : i32
    return %arg0, %arg1, %c0_i32 : i32, i32, i32
  }
}

</mosaic_0001>

<bundles_post_ra>
// kernel: tpu_custom_call.1
= control target key start
LH: loop header
LB: loop body
LE: loop exit
PB: predicated region body
PF: predicated region fallthrough
CT: control target
= control target key end

     0   :  { %s2081_s0 = inlined_call_operand.hbm [shape: f32[8,8,8], index: 0, kind: input, shape index: {}]   ;;  %s2082_s1 = inlined_call_operand.hbm [shape: f32[8,8,8], index: 1, kind: input, shape index: {}]   ;;  %s2083_s2 = inlined_call_operand.hbm [shape: f32[8,8,8], index: 2, kind: input, shape index: {}]   ;;  %s2084_s3 = inlined_call_operand.hbm [shape: f32[2,8,32], index: 3, kind: output, shape index: {}]  }
   0x1   :  { %2094 = sst [smem:[#allocation19_spill]] %s2082_s1 }
   0x2   :  { %8 = vsyncpa [#allocation7], 0 }
   0x3   :  { %10 = vsyncpa [#allocation7 + $0x1], 0 }
   0x4   :  { %11 = vsyncpa [#allocation10], 0 }
   0x5   :  { %13 = vsyncpa [#allocation10 + $0x1], 0 }
   0x6   :  { %14 = vsyncpa [#allocation8], 0 }
   0x7   :  { %16 = vsyncpa [#allocation8 + $0x1], 0  ;;  %s1690_s12 = smov 0   ;;  %s1692_s13 = smov 0  }
   0x8   :  { %s1694_s14 = smov 0   ;;  %s1696_s15 = smov 0  }
   0x9   :  { %s1698_s16 = smov 0   ;;  %s1700_s17 = smov 0  }
   0xa LB: > { %2095 = sst [smem:[#allocation16_spill]] %s1651_s16  ;;  %s1721_s18 = sadd.s32 4294967295, %s1655_s17   ;;  %s1655_s17 = sphi %s1700_s17, %s22_s17   ;;  %s1651_s16 = sphi %s1698_s16, %s2118_s16   ;;  %s1647_s15 = sphi %s1696_s15, %s2117_s15   ;;  %s1643_s14 = sphi %s1694_s14, %s2121_s14   ;;  %s1639_s13 = sphi %s1692_s13, %s2120_s13   ;;  %s1635_s12 = sphi %s1690_s12, %s2119_s12  }
   0xb   : > { %s1280_s19 = sadd.s32 4294967294, %s1655_s17   ;;  %s41_s20 = sadd.s32 1, %s1651_s16 }
   0xc   : > { %s50_s21 = sadd.s32 1, %s1643_s14  ;;  %p43_p0 = scmp.ge.s32.totalorder %s41_s20, 2 }
   0xd   : > { %p57_p1 = scmp.ne.s32.totalorder %s1643_s14, %s1639_s13  ;;  %p58_p2 = scmp.eq.s32.totalorder %s1655_s17, 0 }
   0xe   : > { %p63_p3 = scmp.ne.s32.totalorder %s1639_s13, %s1635_s12  ;;  %s2123_s20 = smov (%p43_p0, %s41_s20), 0 }
   0xf   : > { %2096 = sst [smem:[#allocation17_spill]] %s2123_s20  ;;  %p1733_p4 = por %p58_p2, %p57_p1 }
  0x10   : > { %p64_p5 = scmp.eq.s32.totalorder %s1721_s18, 0  ;;  %s45_s23 = ssub.s32 %s1651_s16, %s2123_s20 }
  0x11   : > { %p145_p6 = scmp.eq.s32.totalorder %s1721_s18, 1  ;;  %p48_p7 = scmp.eq.s32.totalorder %s45_s23, 0 }
  0x12   : > { %p1741_p8 = por %p64_p5, %p63_p3  ;;  %p151_p10 = scmp.eq.s32.totalorder %s1280_s19, 1 }
  0x13   : > { %p1745_p9 = por %p145_p6, %p57_p1  ;;  %p1394_p13 = scmp.lt.s32.totalorder %s1655_s17, 2 }
  0x14   : > { %s2098_s24 = scalar_select %p1741_p8, 1, 0 }
  0x15   : > { %s2099_s25 = scalar_select %p1745_p9, 1, 0 }
  0x16   : > { %s1750_s26 = scalar_select %p48_p7, %s1643_s14, %s50_s21  }
  0x17   : > { %p1752_p11 = por %p151_p10, %p63_p3  ;;  %s2087_s28 = sand.u32 1, %s1643_s14  }
  0x18   : > { %2100 = sst [smem:[#allocation18_spill]] %s1750_s26  ;;  %s1761_s29 = sshll.u32 %s2087_s28, 5 }
  0x19   : > { %s2101_s27 = scalar_select %p1752_p11, 1, 0 }
  0x1a   : > { %s1764_s30 = sshll.u32 %s1651_s16, 9  ;;  %p1768_p0 = pnand %p1394_p13, %p1733_p4 }
  0x1b   : > { %s193_s5 = sand.u32 1, %s1655_s17   ;;  %s2103_s1 = sld [smem:[#allocation19_spill]] }
  0x1c   : > { %s197_s9 = scalar_lea.vmem [#allocation9], %s1761_s29  ;;  %s1784_s11 = scalar_lea.sflag [#allocation10], %s193_s5 }
  0x1d   : > { %s205_s10 = sshll.u32 %s197_s9, 4  ;;  %p1790_p4 = pneg %p1768_p0  ;;  %s1781_s10 = int_to_ptr.vmem [resolvable:$true] %s205_s10 }
  0x21   : > { %s1777_s8 = scalar_lea.hbm %s2103_s1, %s1764_s30  ;;  %s1484_s6 = scalar_lea.hbm %s2103_s1, 1024 }
  0x22   : > { %s1479_s19 = scalar_lea.hbm %s1777_s8, 512  ;;  %p1485_p7 = scmp.lt.u32.totalorder %s1777_s8, %s2103_s1 }
  0x23   : > { %p1480_p3 = scmp.ne.s32.totalorder %s1777_s8, %s1479_s19  ;;  %p1486_p10 = scmp.lt.u32.totalorder %s1484_s6, %s1479_s19 }
  0x24   : > { %p1488_p12 = scmp.lt.u32.totalorder %s1479_s19, %s1777_s8 }
  0x25   : > { %p1482_p5 = pnand %p1790_p4, %p1480_p3  ;;  %p1487_p13 = por %p1486_p10, %p1485_p7 }
  0x27   : > { %p1483_p6 = pneg %p1482_p5  ;;  %p1489_p1 = por %p1488_p12, %p1487_p13 }
  0x29   : > { %p1490_p2 = pnand %p1489_p1, %p1483_p6 }
  0x2b   : > { %1493 = shalt.err (!%p1490_p2)
}
  0x2c   : > { %s1494_s5 = scalar_lea.vmem %s1781_s10, 512  ;;  %s1657_s22 = smov [#allocation9]  }
  0x2d   : > { %p1495_p3 = scmp.ne.s32.totalorder %s1781_s10, %s1494_s5  ;;  %s1499_s23 = sshll.u32 %s1657_s22, 4  ;;  %s1500_s23 = int_to_ptr.vmem [resolvable:$false] %s1499_s23 }
  0x2e   : > { %s1501_s7 = scalar_lea.vmem %s1500_s23, 1024  ;;  %p1502_p9 = scmp.lt.s32.totalorder %s1781_s10, %s1500_s23 }
  0x2f   : > { %p1497_p5 = pnand %p1495_p3, %p1790_p4  ;;  %p1503_p8 = scmp.lt.s32.totalorder %s1501_s7, %s1494_s5 }
  0x31   : > { %p1498_p11 = pneg %p1497_p5  ;;  %p1504_p7 = por %p1503_p8, %p1502_p9 }
  0x33   : > { %p1505_p10 = pnand %p1504_p7, %p1498_p11 }
  0x35   : > { %1508 = shalt.err (!%p1505_p10)
}
  0x36   : > { %s2088_s19 = smov 128   ;;  %s2090_s6 = smov 8  }
  0x37   : > { %1386 = dma.hbm_to_vmem [thread:$0]  (!%p1768_p0), %s1777_s8, 512, %s1781_s10, %s1784_s11, %s2088_s19, %s2088_s19, %s2090_s6  }
  0x38   : > { %p2105_p8 = scmp.lt.s32.totalorder %s1655_s17, 3  ;;  %p2106_p9 = scmp.ge.s32.totalorder %s1655_s17, 1 }
  0x39   : > { %s1829_s23 = scalar_lea.hbm %s2081_s0, %s1764_s30  ;;  %s175_s7 = scalar_lea.vmem [#allocation6], %s1761_s29 }
  0x3a   : > { %p1821_p11 = pnand %p2106_p9, %p2105_p8  ;;  %s183_s28 = sshll.u32 %s175_s7, 4  ;;  %s1832_s28 = int_to_ptr.vmem [resolvable:$true] %s183_s28 }
  0x3b   : > { %s1838_s19 = scalar_lea.hbm %s2083_s2, %s1764_s30  ;;  %s2108_s6 = sand.u32 1, %s1643_s14  }
  0x3c   : > { %s2107_s9 = scalar_select %p1821_p11, 1, 0 }
  0x3d   : > { %s1842_s1 = scalar_lea.sflag [#allocation7], %s2108_s6  ;;  %s1509_s20 = scalar_lea.hbm %s1829_s23, 512 }
  0x3e   : > { %p1510_p12 = scmp.ne.s32.totalorder %s1829_s23, %s1509_s20  ;;  %s1514_s16 = scalar_lea.hbm %s2081_s0, 1024 }
  0x3f   : > { %p1515_p6 = scmp.lt.u32.totalorder %s1829_s23, %s2081_s0  ;;  %p1516_p13 = scmp.lt.u32.totalorder %s1514_s16, %s1509_s20 }
  0x40   : > { %p1512_p1 = pnand %p1510_p12, %p1790_p4  ;;  %p1518_p5 = scmp.lt.u32.totalorder %s1509_s20, %s1829_s23 }
  0x41   : > { %p1517_p3 = por %p1516_p13, %p1515_p6 }
  0x42   : > { %p1513_p2 = pneg %p1512_p1 }
  0x43   : > { %p1519_p7 = por %p1518_p5, %p1517_p3 }
  0x45   : > { %p1520_p10 = pnand %p1519_p7, %p1513_p2 }
  0x47   : > { %1523 = shalt.err (!%p1520_p10)
}
  0x48   : > { %s1524_s30 = scalar_lea.vmem %s1832_s28, 512  ;;  %s1660_s6 = smov [#allocation6]  }
  0x49   : > { %p1525_p8 = scmp.ne.s32.totalorder %s1832_s28, %s1524_s30  ;;  %s1529_s8 = sshll.u32 %s1660_s6, 4  ;;  %s1530_s8 = int_to_ptr.vmem [resolvable:$false] %s1529_s8 }
  0x4a   : > { %s1531_s26 = scalar_lea.vmem %s1530_s8, 1024  ;;  %p1532_p1 = scmp.lt.s32.totalorder %s1832_s28, %s1530_s8 }
  0x4b   : > { %p1527_p9 = pnand %p1525_p8, %p1790_p4  ;;  %p1533_p11 = scmp.lt.s32.totalorder %s1531_s26, %s1524_s30 }
  0x4d   : > { %p1528_p12 = pneg %p1527_p9  ;;  %p1534_p6 = por %p1533_p11, %p1532_p1 }
  0x4f   : > { %p1535_p13 = pnand %p1534_p6, %p1528_p12 }
  0x51   : > { %1538 = shalt.err (!%p1535_p13)
}
  0x52   : > { %s2109_s16 = smov 8   ;;  %s2110_s20 = smov 128  }
  0x53   : > { %1383 = dma.hbm_to_vmem [thread:$0]  (!%p1768_p0), %s1829_s23, 512, %s1832_s28, %s1842_s1, %s2110_s20, %s2110_s20, %s2109_s16  }
  0x54   : > { %s219_s10 = scalar_lea.vmem [#allocation11], %s1761_s29  ;;  %s1539_s22 = scalar_lea.hbm %s1838_s19, 512 }
  0x55   : > { %s227_s5 = sshll.u32 %s219_s10, 4  ;;  %p1540_p11 = scmp.ne.s32.totalorder %s1838_s19, %s1539_s22  ;;  %s1870_s5 = int_to_ptr.vmem [resolvable:$true] %s227_s5 }
  0x56   : > { %s1544_s6 = scalar_lea.hbm %s2083_s2, 1024  ;;  %p1545_p5 = scmp.lt.u32.totalorder %s1838_s19, %s2083_s2 }
  0x57   : > { %p1542_p2 = pnand %p1540_p11, %p1790_p4  ;;  %p1546_p7 = scmp.lt.u32.totalorder %s1544_s6, %s1539_s22 }
  0x58   : > { %p1548_p8 = scmp.lt.u32.totalorder %s1539_s22, %s1838_s19 }
  0x59   : > { %p1543_p3 = pneg %p1542_p2  ;;  %p1547_p10 = por %p1546_p7, %p1545_p5 }
  0x5b   : > { %p1549_p9 = por %p1548_p8, %p1547_p10 }
  0x5d   : > { %p1550_p12 = pnand %p1549_p9, %p1543_p3 }
  0x5f   : > { %1553 = shalt.err (!%p1550_p12)
}
  0x60   : > { %s1554_s1 = scalar_lea.vmem %s1870_s5, 512  ;;  %s1661_s28 = smov [#allocation11]  }
  0x61   : > { %p1555_p1 = scmp.ne.s32.totalorder %s1870_s5, %s1554_s1  ;;  %s1559_s29 = sshll.u32 %s1661_s28, 4  ;;  %s1560_s29 = int_to_ptr.vmem [resolvable:$false] %s1559_s29 }
  0x62   : > { %s1561_s23 = scalar_lea.vmem %s1560_s29, 1024  ;;  %p1562_p11 = scmp.lt.s32.totalorder %s1870_s5, %s1560_s29 }
  0x63   : > { %p1557_p6 = pnand %p1555_p1, %p1790_p4  ;;  %p1563_p2 = scmp.lt.s32.totalorder %s1561_s23, %s1554_s1 }
  0x65   : > { %p1558_p13 = pneg %p1557_p6  ;;  %p1564_p5 = por %p1563_p2, %p1562_p11 }
  0x67   : > { %p1565_p7 = pnand %p1564_p5, %p1558_p13 }
  0x69   : > { %1568 = shalt.err (!%p1565_p7)
}
  0x6a   : > { %1389 = dma.hbm_to_vmem [thread:$0]  (!%p1768_p0), %s1838_s19, 512, %s1870_s5, %s1784_s11, %s2110_s20, %s2110_s20, %s2109_s16  }
  0x6b   : > { %p2111_p4 = scmp.ne.s32.totalorder %s2107_s9, 0 }
  0x6c   : > { %s1900_s21 = sand.u32 (!%p2111_p4), 1, %s1639_s13   ;;  %p2112_p3 = scmp.ne.s32.totalorder (!%p2111_p4), %s2098_s24, 0 }
  0x6d   : > { %239 = sbr.rel (%p2111_p4) target bundleno = 1071 (0x42f), region = 32  ;;  %s1903_s10 = sshll.u32 (!%p2111_p4), %s1900_s21, 5 }
  0x6e   : > { %s242_s4 = scalar_lea.sflag (!%p2111_p4), [#allocation7], %s1900_s21  ;;  %s1907_s22 = scalar_lea.vmem (!%p2111_p4), [#allocation6], %s1903_s10 }
  0x74   : > { %1622 = dma.done.wait (%p2112_p3), %s242_s4, 512  }
  0x75   : > { %1624 = vsyncadd (%p2112_p3), %s242_s4, 4294966784  ;;  %s250_s11 = sand.u32 1, %s1721_s18   ;;  %s1915_s9 = scalar_lea.vmem [#allocation9], %s1903_s10 }
  0x76   : > { %s251_s19 = scalar_lea.sflag [#allocation10], %s250_s11 }
  0x77   : > { %1626 = dma.done.wait (%p2112_p3), %s251_s19, 1024  }
  0x78   : > { %1628 = vsyncadd (%p2112_p3), %s251_s19, 4294966272  ;;  %vm311_vm0 = vcmask 64512   ;;  %v1662_v0 = vmov 0.0   ;;  %vm1663_vm1 = vmmov 0   ;;  %v333_v1 = vld [vmem:[%s1915_s9] sm:$0xff]  ;;  %v334_v3 = vld [vmem:[%s1915_s9 + $0x8] sm:$0xff] }
  0x79   : > { %1332 = vmatprep.subr.mxu0 %v1662_v0  ;;  %325 = vst.msk [vmem:[#allocation5] sm:$0xff] %vm311_vm0, %v1662_v0  ;;  %326 = vst.msk [vmem:[#allocation5 + $0x8] sm:$0xff] %vm311_vm0, %v1662_v0  ;;  %1334 = vmatprep.mubr.msk.f32.mxu0 %vm1663_vm1, %v1662_v0  ;;  %v303_v2 = vld [vmem:[%s1907_s22] sm:$0xff]  ;;  %v304_v5 = vld [vmem:[%s1907_s22 + $0x8] sm:$0xff]  ;;  %vm316_vm2 = vcmask 7168   ;;  %v1664_v17 = vmov -inf  }
  0x7a   : > { %327 = vst.msk [vmem:[#allocation5 + $0x10] sm:$0xff] %vm311_vm0, %v1662_v0  ;;  %328 = vst.msk [vmem:[#allocation5 + $0x18] sm:$0xff] %vm311_vm0, %v1662_v0  ;;  %1337 = vmatprep.subr.mxu1 %v1662_v0  ;;  %1339 = vmatprep.mubr.msk.f32.mxu1 %vm1663_vm1, %v1662_v0  ;;  %v307_v4 = vmul.f32 0.5100697, %v303_v2  ;;  %v305_v6 = vld [vmem:[%s1907_s22 + $0x10] sm:$0xff]  ;;  %v306_v9 = vld [vmem:[%s1907_s22 + $0x18] sm:$0xff] }
  0x7b   : > { %1333 = vmatpush3.xpose.msk.msra.mxu0 %vm311_vm0, %v333_v1  ;;  %1338 = vmatpush3.xpose.msk.msra.mxu1 %vm311_vm0, %v334_v3  ;;  %v308_v7 = vmul.f32 0.5100697, %v304_v5  ;;  %v309_v8 = vmul.f32 0.5100697, %v305_v6  ;;  %v310_v10 = vmul.f32 0.5100697, %v306_v9 }
  0x7c   : > { %1342 = vmatprep.subr.mxu0 %v1662_v0  ;;  %1347 = vmatprep.subr.mxu1 %v1662_v0  ;;  %312 = vst.msk [vmem:[#allocation2] sm:$0xff] %vm311_vm0, %v307_v4  ;;  %v335_v11 = vld [vmem:[%s1915_s9 + $0x10] sm:$0xff]  ;;  %v336_v13 = vld [vmem:[%s1915_s9 + $0x18] sm:$0xff]  ;;  %v1665_v30 = vmov 0   ;;  %s263_s18 = scalar_lea.vmem [#allocation11], %s1903_s10  ;;  %s1666_s24 = smov 8  }
  0x7d   : > { %313 = vst.msk [vmem:[#allocation2 + $0x8] sm:$0xff] %vm311_vm0, %v308_v7  ;;  %314 = vst.msk [vmem:[#allocation2 + $0x10] sm:$0xff] %vm311_vm0, %v309_v8  ;;  %1453 = vset.pattern.permute.xlu0 %v1665_v30  ;;  %1454 = vset.pattern.permute.xlu1 %v1665_v30  ;;  %v337_v47 = vld [vmem:[%s263_s18] sm:$0xff]  ;;  %v338_v48 = vld [vmem:[%s263_s18 + $0x8] sm:$0xff]  ;;  %s1667_s16 = smov 16   ;;  %s1668_s20 = smov 24  }
  0x7e   : > { %315 = vst.msk [vmem:[#allocation2 + $0x18] sm:$0xff] %vm311_vm0, %v310_v10  ;;  %v339_v56 = vld [vmem:[%s263_s18 + $0x10] sm:$0xff]  ;;  %v340_v59 = vld [vmem:[%s263_s18 + $0x18] sm:$0xff]  ;;  %s1296_s5 = sshll.u32 %s1900_s21, 3  ;;  %vm1119_vm3 = vcmask 130112   ;;  %vm1125_vm4 = vcmask 195712  }
  0x7f   : > { %317 = vst.msk [vmem:[#allocation3] sm:$0xff] %vm316_vm2, %v1664_v17  ;;  %318 = vst.msk [vmem:[#allocation3 + $0x8] sm:$0xff] %vm316_vm2, %v1664_v17  ;;  %s295_s7 = scalar_lea.vmem [#allocation12], %s1296_s5  ;;  %s1310_s30 = sshll.u32 %s1647_s15, 7  ;;  %vm1131_vm5 = vcmask 261312  }
  0x80   : > { %319 = vst.msk [vmem:[#allocation3 + $0x10] sm:$0xff] %vm316_vm2, %v1664_v17  ;;  %320 = vst.msk [vmem:[#allocation3 + $0x18] sm:$0xff] %vm316_vm2, %v1664_v17  ;;  %s1148_s6 = sshll.u32 %s295_s7, 4  ;;  %s2032_s1 = scalar_lea.hbm %s2084_s3, %s1310_s30  ;;  %s2034_s6 = int_to_ptr.vmem [resolvable:$true] %s1148_s6 }
  0x81   : > { %321 = vst.msk [vmem:[#allocation4] sm:$0xff] %vm316_vm2, %v1662_v0  ;;  %322 = vst.msk [vmem:[#allocation4 + $0x8] sm:$0xff] %vm316_vm2, %v1662_v0  ;;  %s1134_s28 = scalar_lea.sflag [#allocation8], %s1900_s21  ;;  %s1569_s29 = scalar_lea.vmem %s2034_s6, 128 }
  0x82   : > { %323 = vst.msk [vmem:[#allocation4 + $0x10] sm:$0xff] %vm316_vm2, %v1662_v0  ;;  %324 = vst.msk [vmem:[#allocation4 + $0x18] sm:$0xff] %vm316_vm2, %v1662_v0  ;;  %p1570_p0 = scmp.ne.s32.totalorder %s2034_s6, %s1569_s29  ;;  %p2113_p10 = scmp.ne.s32.totalorder %s2099_s25, 0 }
  0x83   : > { %v329_v12 = vld [vmem:[#allocation2] sm:$0xff]  ;;  %s1669_s15 = smov [#allocation12]  }
  0x84   : > { %1335 = vmatmul.mubr.msk.f32.vlgmr.msra.gmra.mrb[0].mxu0 %vm311_vm0, %v329_v12  ;;  %v330_v14 = vld [vmem:[#allocation2 + $0x8] sm:$0xff]  ;;  %v331_v15 = vld [vmem:[#allocation2 + $0x10] sm:$0xff]  ;;  %p1571_p8 = pnand %p1570_p0, %p2113_p10  ;;  %s1573_s23 = sshll.u32 %s1669_s15, 4  ;;  %s1574_s23 = int_to_ptr.vmem [resolvable:$false] %s1573_s23 }
  0x85   : > { %1340 = vmatmul.mubr.msk.f32.vlgmr.msra.gmra.mrb[0].mxu1 %vm311_vm0, %v330_v14  ;;  %1343 = vmatpush3.xpose.msk.msra.mxu0 %vm311_vm0, %v335_v11  ;;  %v332_v16 = vld [vmem:[#allocation2 + $0x18] sm:$0xff]  ;;  %s1575_s10 = scalar_lea.vmem %s1574_s23, 256  ;;  %p1576_p12 = scmp.lt.s32.totalorder %s2034_s6, %s1574_s23 }
  0x86   : > { %1344 = vmatprep.mubr.msk.f32.mxu0 %vm1663_vm1, %v1662_v0  ;;  %1348 = vmatpush3.xpose.msk.msra.mxu1 %vm311_vm0, %v336_v13  ;;  %v1983_v31 = vld [vmem:[#allocation3] sm:$0xff]  ;;  %v1988_v34 = vld [vmem:[#allocation3 + $0x8] sm:$0xff]  ;;  %p1572_p9 = pneg %p1571_p8  ;;  %p1577_p1 = scmp.lt.s32.totalorder %s1575_s10, %s1569_s29 }
  0x87   : > { %1349 = vmatprep.mubr.msk.f32.mxu1 %vm1663_vm1, %v1662_v0  ;;  %1352 = vmatprep.subr.mxu0 %v1662_v0  ;;  %v648_v35 = vld [vmem:[#allocation3 + $0x10] sm:$0xff]  ;;  %v649_v41 = vld [vmem:[#allocation3 + $0x18] sm:$0xff] }
  0x88   : > { %1345 = vmatmul.mubr.msk.f32.vlgmr.msra.gmra.mrb[2].mxu0 %vm311_vm0, %v331_v15  ;;  %1357 = vmatprep.subr.mxu1 %v1662_v0  ;;  %v703_v6 = vld [vmem:[#allocation4 + $0x8] sm:$0xff]  ;;  %p1578_p6 = por %p1577_p1, %p1576_p12 }
  0x89   : > { %1350 = vmatmul.mubr.msk.f32.vlgmr.msra.gmra.mrb[2].mxu1 %vm311_vm0, %v332_v16  ;;  %1354 = vmatprep.mubr.msk.f32.mxu0 %vm1663_vm1, %v1662_v0  ;;  %v704_v9 = vld [vmem:[#allocation4 + $0x10] sm:$0xff]  ;;  %v705_v13 = vld [vmem:[#allocation4 + $0x18] sm:$0xff] }
  0x8a   : > { %1359 = vmatprep.mubr.msk.f32.mxu1 %vm1663_vm1, %v1662_v0  ;;  %1353 = vmatpush3.msra.mxu0 %v337_v47  ;;  %p1579_p13 = pnand %p1578_p6, %p1572_p9 }
  0x8b   : > { %1362 = vmatprep.subr.mxu0 %v1662_v0  ;;  %1358 = vmatpush3.msra.mxu1 %v338_v48  ;;  %v1025_v48 = vld [vmem:[#allocation5 + $0x10] sm:$0xff] }
  0x8c   : > { %1367 = vmatprep.subr.mxu1 %v1662_v0 }
 0x157   : > { %v414_v18 = vpop.f32.mrb[0].mxu0 }
 0x158   : > { %v1336_v19 = vpop.f32.mrb[1].mxu0  ;;  %v650_v20 = vsel %vm311_vm0, %v414_v18, -inf  ;;  %v490_v21 = vpop.f32.mrb[0].mxu1 }
 0x159   : > { %651 = vmax.xlane.f32.xlu0 %v650_v20  ;;  %v1341_v22 = vpop.f32.mrb[1].mxu1  ;;  %v653_v23 = vsel %vm311_vm0, %v490_v21, -inf }
 0x15b   : > { %v566_v24 = vpop.f32.mrb[2].mxu0 }
 0x15c   : > { %v1346_v25 = vpop.f32.mrb[3].mxu0  ;;  %v656_v26 = vsel %vm311_vm0, %v566_v24, -inf  ;;  %v642_v27 = vpop.f32.mrb[2].mxu1 }
 0x15d   : > { %654 = vmax.xlane.f32.xlu0 %v653_v23  ;;  %657 = vmax.xlane.f32.xlu1 %v656_v26  ;;  %v1351_v28 = vpop.f32.mrb[3].mxu1  ;;  %v659_v29 = vsel %vm311_vm0, %v642_v27, -inf }
 0x161   : > { %660 = vmax.xlane.f32.xlu1 %v659_v29 }
 0x1e6   : > { %v652_v32 = vpop.xlane.xlu0 %651 }
 0x1e7   : > { %v1986_v33 = vmax.f32 %v1983_v31, %v652_v32 }
 0x1e9   : > { %v666_v36 = vsub.f32 %v1983_v31, %v1986_v33  ;;  %1059 = vst.msk [vmem:[#allocation3] sm:$0xff] %vm316_vm2, %v1986_v33  ;;  %676 = vperm.xlu0 %1453, %v1986_v33  }
 0x1ea   : > { %v655_v37 = vpop.xlane.xlu0 %654  ;;  %v658_v38 = vpop.xlane.xlu1 %657 }
 0x1eb   : > { %v663_v39 = vmax.f32 %v1988_v34, %v655_v37  ;;  %v664_v40 = vmax.f32 %v648_v35, %v658_v38 }
 0x1ed   : > { %v667_v42 = vsub.f32 %v1988_v34, %v663_v39  ;;  %1060 = vst.msk [vmem:[#allocation3 + $0x8] sm:$0xff] %vm316_vm2, %v663_v39  ;;  %681 = vperm.xlu1 %1454, %v663_v39   ;;  %v668_v43 = vsub.f32 %v648_v35, %v664_v40  ;;  %1061 = vst.msk [vmem:[#allocation3 + $0x10] sm:$0xff] %vm316_vm2, %v664_v40 }
 0x1ee   : > { %v661_v44 = vpop.xlane.xlu1 %660 }
 0x1ef   : > { %v665_v45 = vmax.f32 %v649_v41, %v661_v44 }
 0x1f1   : > { %686 = vperm.xlu1 %1454, %v664_v40   ;;  %v669_v46 = vsub.f32 %v649_v41, %v665_v45  ;;  %1062 = vst.msk [vmem:[#allocation3 + $0x18] sm:$0xff] %vm316_vm2, %v665_v45 }
 0x1f5   : > { %691 = vperm.xlu1 %1454, %v665_v45  }
 0x268   : > { %v677_v49 = vpop.permute.xlu0 %676 }
 0x269   : > { %v694_v50 = vsub.f32 %v414_v18, %v677_v49  ;;  %v702_v18 = vld [vmem:[#allocation4] sm:$0xff] }
 0x26b   : > { %1455 = vpow2.f32 %v694_v50 }
 0x26c   : > { %v682_v51 = vpop.permute.xlu1 %681 }
 0x26d   : > { %v695_v52 = vsub.f32 %v490_v21, %v682_v51 }
 0x26f   : > { %1457 = vpow2.f32 %v695_v52 }
 0x270   : > { %v687_v53 = vpop.permute.xlu1 %686 }
 0x271   : > { %v696_v54 = vsub.f32 %v566_v24, %v687_v53 }
 0x273   : > { %1459 = vpow2.f32 %v696_v54  ;;  %v1026_v54 = vld [vmem:[#allocation5 + $0x18] sm:$0xff] }
 0x274   : > { %v692_v55 = vpop.permute.xlu1 %691 }
 0x275   : > { %v1456_v57 = vpop.eup %1455  ;;  %v697_v58 = vsub.f32 %v642_v27, %v692_v55 }
 0x276   : > { %1355 = vmatmul.mubr.msk.f32.vlgmr.msra.gmra.mrb[4].mxu0 %vm311_vm0, %v1456_v57  ;;  %v710_v3 = vsel %vm311_vm0, %v1456_v57, 0.0 }
 0x277   : > { %1461 = vpow2.f32 %v697_v58  ;;  %1363 = vmatpush3.msra.mxu0 %v339_v56  ;;  %1364 = vmatprep.mubr.msk.f32.mxu0 %vm1663_vm1, %v1662_v0 }
 0x278   : > { %1463 = vpow2.f32 %v668_v43  ;;  %v1024_v43 = vld [vmem:[#allocation5 + $0x8] sm:$0xff] }
 0x279   : > { %v1458_v60 = vpop.eup %1457  ;;  %1465 = vpow2.f32 %v667_v42 }
 0x27a   : > { %1360 = vmatmul.mubr.msk.f32.vlgmr.msra.gmra.mrb[4].mxu1 %vm311_vm0, %v1458_v60  ;;  %v713_v61 = vsel %vm311_vm0, %v1458_v60, 0.0  ;;  %1467 = vpow2.f32 %v669_v46 }
 0x27b   : > { %714 = vadd.xlane.f32.xlu1 %v713_v61  ;;  %1368 = vmatpush3.msra.mxu1 %v340_v59  ;;  %1469 = vpow2.f32 %v666_v36 }
 0x27c   : > { %1369 = vmatprep.mubr.msk.f32.mxu1 %vm1663_vm1, %v1662_v0 }
 0x27d   : > { %v1460_v62 = vpop.eup %1459 }
 0x27e   : > { %1365 = vmatmul.mubr.msk.f32.vlgmr.msra.gmra.mrb[6].mxu0 %vm311_vm0, %v1460_v62  ;;  %v716_v63 = vsel %vm311_vm0, %v1460_v62, 0.0 }
 0x27f   : > { %717 = vadd.xlane.f32.xlu0 %v716_v63 }
 0x281   : > { %v1462_v1 = vpop.eup %1461 }
 0x282   : > { %1370 = vmatmul.mubr.msk.f32.vlgmr.msra.gmra.mrb[6].mxu1 %vm311_vm0, %v1462_v1  ;;  %v719_v2 = vsel %vm311_vm0, %v1462_v1, 0.0  ;;  %v1464_v4 = vpop.eup %1463 }
 0x283   : > { %720 = vadd.xlane.f32.xlu1 %v719_v2  ;;  %v1466_v0 = vpop.eup %1465  ;;  %v708_v11 = vmul.f32 %v1464_v4, %v704_v9 }
 0x284   : > { %v1468_v5 = vpop.eup %1467  ;;  %v707_v7 = vmul.f32 %v1466_v0, %v703_v6 }
 0x285   : > { %v709_v15 = vmul.f32 %v1468_v5, %v705_v13  ;;  %v1470_v16 = vpop.eup %1469 }
 0x286   : > { %v706_v21 = vmul.f32 %v1470_v16, %v702_v18 }
 0x287   : > { %711 = vadd.xlane.f32.xlu1 %v710_v3 }
 0x295   : > { %1039 = vperm.xlu0 %1453, %v1464_v4  }
 0x298   : > { %1034 = vperm.xlu1 %1454, %v1466_v0  }
 0x29c   : > { %1044 = vperm.xlu1 %1454, %v1468_v5   ;;  %v1023_v5 = vld [vmem:[#allocation5] sm:$0xff] }
 0x308   : > { %v715_v8 = vpop.xlane.xlu1 %714 }
 0x309   : > { %v723_v10 = vadd.f32 %v715_v8, %v707_v7 }
 0x30b   : > { %728 = vst.msk [vmem:[#allocation4 + $0x8] sm:$0xff] %vm316_vm2, %v723_v10 }
 0x30c   : > { %v718_v12 = vpop.xlane.xlu0 %717 }
 0x30d   : > { %v724_v14 = vadd.f32 %v718_v12, %v708_v11 }
 0x30f   : > { %729 = vst.msk [vmem:[#allocation4 + $0x10] sm:$0xff] %vm316_vm2, %v724_v14 }
 0x310   : > { %v721_v17 = vpop.xlane.xlu1 %720 }
 0x311   : > { %v725_v19 = vadd.f32 %v721_v17, %v709_v15 }
 0x312   : > { %v1067_v20 = vld [vmem:[#allocation4 + $0x8] sm:$0xff] }
 0x313   : > { %730 = vst.msk [vmem:[#allocation4 + $0x18] sm:$0xff] %vm316_vm2, %v725_v19  ;;  %1471 = vrcp.f32 %v1067_v20 }
 0x314   : > { %v712_v22 = vpop.xlane.xlu1 %711  ;;  %v1040_v49 = vpop.permute.xlu0 %1039 }
 0x315   : > { %v722_v23 = vadd.f32 %v712_v22, %v706_v21  ;;  %v1049_v53 = vmul.f32 %v1040_v49, %v1025_v48 }
 0x316   : > { %v1068_v24 = vld [vmem:[#allocation4 + $0x10] sm:$0xff] }
 0x317   : > { %727 = vst.msk [vmem:[#allocation4] sm:$0xff] %vm316_vm2, %v722_v23  ;;  %1473 = vrcp.f32 %v1068_v24 }
 0x318   : > { %v1035_v44 = vpop.permute.xlu1 %1034 }
 0x319   : > { %v1048_v47 = vmul.f32 %v1035_v44, %v1024_v43 }
 0x31a   : > { %v1069_v25 = vld [vmem:[#allocation4 + $0x18] sm:$0xff] }
 0x31b   : > { %1475 = vrcp.f32 %v1069_v25 }
 0x31c   : > { %v1045_v55 = vpop.permute.xlu1 %1044 }
 0x31d   : > { %v1472_v26 = vpop.eup %1471  ;;  %v1050_v59 = vmul.f32 %v1045_v55, %v1026_v54 }
 0x31e   : > { %v1075_v27 = vmul.f32 %v1472_v26, %v1067_v20  ;;  %v1066_v28 = vld [vmem:[#allocation4] sm:$0xff] }
 0x31f   : > { %1477 = vrcp.f32 %v1066_v28 }
 0x320   : > { %v1079_v29 = vsub.f32 2.0, %v1075_v27 }
 0x321   : > { %v1474_v30 = vpop.eup %1473 }
 0x322   : > { %v1083_v31 = vmul.f32 %v1472_v26, %v1079_v29  ;;  %v1076_v32 = vmul.f32 %v1474_v30, %v1068_v24 }
 0x324   : > { %1097 = vperm.xlu1 %1454, %v1083_v31   ;;  %v1080_v33 = vsub.f32 2.0, %v1076_v32 }
 0x325   : > { %v1476_v34 = vpop.eup %1475 }
 0x326   : > { %v1084_v35 = vmul.f32 %v1474_v30, %v1080_v33  ;;  %v1077_v36 = vmul.f32 %v1476_v34, %v1069_v25 }
 0x328   : > { %1102 = vperm.xlu1 %1454, %v1084_v35   ;;  %v1081_v37 = vsub.f32 2.0, %v1077_v36 }
 0x329   : > { %v1478_v38 = vpop.eup %1477 }
 0x32a   : > { %v1085_v39 = vmul.f32 %v1476_v34, %v1081_v37  ;;  %v1074_v40 = vmul.f32 %v1478_v38, %v1066_v28 }
 0x32c   : > { %1029 = vperm.xlu1 %1454, %v1470_v16   ;;  %1107 = vperm.xlu0 %1453, %v1085_v39   ;;  %v1078_v41 = vsub.f32 2.0, %v1074_v40 }
 0x32e   : > { %v1082_v42 = vmul.f32 %v1478_v38, %v1078_v41 }
 0x330   : > { %1092 = vperm.xlu0 %1453, %v1082_v42  }
 0x349   : > { %v800_v45 = vpop.f32.mrb[4].mxu0 }
 0x34a   : > { %v1356_v46 = vpop.f32.mrb[5].mxu0 }
 0x34d   : > { %v873_v50 = vpop.f32.mrb[4].mxu1 }
 0x34e   : > { %v1052_v51 = vadd.f32 %v1048_v47, %v873_v50  ;;  %v1361_v52 = vpop.f32.mrb[5].mxu1 }
 0x350   : > { %1056 = vst.msk [vmem:[#allocation5 + $0x8] sm:$0xff] %vm311_vm0, %v1052_v51 }
 0x351   : > { %v946_v56 = vpop.f32.mrb[6].mxu0 }
 0x352   : > { %v1053_v57 = vadd.f32 %v1049_v53, %v946_v56  ;;  %v1366_v58 = vpop.f32.mrb[7].mxu0 }
 0x354   : > { %1057 = vst.msk [vmem:[#allocation5 + $0x10] sm:$0xff] %vm311_vm0, %v1053_v57 }
 0x355   : > { %v1019_v60 = vpop.f32.mrb[6].mxu1 }
 0x356   : > { %v1054_v61 = vadd.f32 %v1050_v59, %v1019_v60  ;;  %v1371_v62 = vpop.f32.mrb[7].mxu1 }
 0x357   : > { %v1087_v63 = vld [vmem:[#allocation5 + $0x8] sm:$0xff] }
 0x358   : > { %1058 = vst.msk [vmem:[#allocation5 + $0x18] sm:$0xff] %vm311_vm0, %v1054_v61 }
 0x35b   : > { %v1088_v4 = vld [vmem:[#allocation5 + $0x10] sm:$0xff] }
 0x35f   : > { %v1089_v7 = vld [vmem:[#allocation5 + $0x18] sm:$0xff] }
 0x3a3   : > { %v1098_v1 = vpop.permute.xlu1 %1097 }
 0x3a4   : > { %v1111_v2 = vmul.f32 %v1098_v1, %v1087_v63 }
 0x3a6   : > { %1116 = vrot.lane.b32.xlu1 %v1111_v2, %s1666_s24 }
 0x3a7   : > { %v1103_v3 = vpop.permute.xlu1 %1102 }
 0x3a8   : > { %v1112_v0 = vmul.f32 %v1103_v3, %v1088_v4 }
 0x3aa   : > { %1122 = vrot.lane.b32.xlu0 %v1112_v0, %s1667_s16 }
 0x3ab   : > { %v1108_v6 = vpop.permute.xlu0 %1107  ;;  %v1030_v8 = vpop.permute.xlu1 %1029 }
 0x3ac   : > { %v1113_v9 = vmul.f32 %v1108_v6, %v1089_v7  ;;  %v1047_v10 = vmul.f32 %v1030_v8, %v1023_v5 }
 0x3ae   : > { %v1051_v11 = vadd.f32 %v1047_v10, %v800_v45  ;;  %1128 = vrot.lane.b32.xlu1 %v1113_v9, %s1668_s20 }
 0x3af   : > { %v1093_v12 = vpop.permute.xlu0 %1092 }
 0x3b0   : > { %1055 = vst.msk [vmem:[#allocation5] sm:$0xff] %vm311_vm0, %v1051_v11 }
 0x3b7   : > { %v1086_v13 = vld [vmem:[#allocation5] sm:$0xff] }
 0x3b8   : > { %v1110_v14 = vmul.f32 %v1093_v12, %v1086_v13 }
 0x3ba   : > { %1114 = vst.msk [vmem:[%s295_s7] sm:$0xff] %vm311_vm0, %v1110_v14 }
 0x418   : > { %v1117_v15 = vpop.permute.xlu1 %1116 }
 0x419   : > { %1120 = vst.msk [vmem:[%s295_s7] sm:$0xff] %vm1119_vm3, %v1117_v15 }
 0x41c   : > { %v1123_v16 = vpop.permute.xlu0 %1122 }
 0x41d   : > { %1126 = vst.msk [vmem:[%s295_s7] sm:$0xff] %vm1125_vm4, %v1123_v16 }
 0x420   : > { %v1129_v17 = vpop.permute.xlu1 %1128 }
 0x421   : > { %1132 = vst.msk [vmem:[%s295_s7] sm:$0xff] %vm1131_vm5, %v1129_v17 }
 0x422   : > { %1582 = shalt.err (!%p1579_p13)
}
 0x423   : > { %s1583_s21 = scalar_lea.hbm %s2032_s1, 128  ;;  %s1587_s11 = scalar_lea.hbm %s2084_s3, 256 }
 0x424   : > { %p1584_p11 = scmp.ne.s32.totalorder %s2032_s1, %s1583_s21  ;;  %p1588_p7 = scmp.lt.u32.totalorder %s2032_s1, %s2084_s3 }
 0x425   : > { %p1589_p4 = scmp.lt.u32.totalorder %s1587_s11, %s1583_s21  ;;  %p1591_p0 = scmp.lt.u32.totalorder %s1583_s21, %s2032_s1 }
 0x426   : > { %p1585_p2 = pnand %p1584_p11, %p2113_p10 }
 0x427   : > { %p1590_p3 = por %p1589_p4, %p1588_p7 }
 0x428   : > { %p1586_p5 = pneg %p1585_p2 }
 0x429   : > { %p1592_p8 = por %p1591_p0, %p1590_p3 }
 0x42b   : > { %p1593_p9 = pnand %p1592_p8, %p1586_p5 }
 0x42d   : > { %1596 = shalt.err (!%p1593_p9)
}
 0x42e   : > { %1378 = dma.vmem_to_hbm [thread:$0]  (%p2113_p10), %s2034_s6, 128, %s2032_s1, %s1134_s28  }
 0x42f PF: > { %s1160_s18 = sand.u32 1, %s1635_s12   ;;  %p2114_p12 = scmp.ne.s32.totalorder %s2101_s27, 0 }
 0x430   : > { %p2115_p1 = scmp.ge.s32.totalorder %s1655_s17, 2  ;;  %s1161_s24 = scalar_lea.sflag [#allocation8], %s1160_s18 }
 0x432   : > { %p1391_p6 = pnand %p2115_p1, %p2114_p12 }
 0x434   : > { %1630 = dma.done.wait (!%p1391_p6), %s1161_s24, 128  }
 0x435   : > { %1632 = vsyncadd (!%p1391_p6), %s1161_s24, 4294967168  ;;  %s22_s17 = sadd.s32 1, %s1655_s17   ;;  %s2116_s25 = sld [smem:[#allocation18_spill]] }
 0x436   : > { %p19_p13 = scmp.ge.s32.totalorder %s22_s17, 4   ;;  %s2117_s15 = sld [smem:[#allocation16_spill]] }
 0x437   : > { %s2118_s16 = sld [smem:[#allocation17_spill]]  ;;  %s2119_s12 = smov %s1639_s13 }
 0x438   : > { %s2120_s13 = smov %s1643_s14  ;;  %21 = sbr.rel (!%p19_p13) target bundleno = 10 (0xa), region = 109 }
 0x43b   : > { %s2121_s14 = smov %s2116_s25 }
 0x43f   :  { %1166 = vsyncpa [#allocation7], 1 }
 0x440   :  { %1168 = vsyncpa [#allocation7 + $0x1], 1 }
 0x441   :  { %1169 = vsyncpa [#allocation10], 1 }
 0x442   :  { %1171 = vsyncpa [#allocation10 + $0x1], 1 }
 0x443   :  { %1172 = vsyncpa [#allocation8], 1 }
 0x444   :  { %1174 = vsyncpa [#allocation8 + $0x1], 1 }

</bundles_post_ra>
